<compile_context>
chip_gen: v5e
topology: v5e:2x2
jax: 0.10.0
libtpu: 0.0.40
codegen_flags: <defaults>
</compile_context>

<pallas_src>
import jax
import jax.numpy as jnp
from jax.experimental import pallas as pl
from jax.experimental.pallas import tpu as pltpu


def _round_up(x, m):
    return (x + m - 1) // m * m


def _graphsage_kernel(h_row_ref, adj_ref, h_k_ref, w_self_t_ref, w_neigh_t_ref,
                      b_ref, o_ref, agg_ref):
    k = pl.program_id(1)

    @pl.when(k == 0)
    def _init():
        agg_ref[...] = jnp.zeros_like(agg_ref)

    # Fused neighbor aggregation for this reduction chunk:
    #   (tm, tk) @ (tk, F_p) -> (tm, F_p), accumulated in f32 scratch.
    # adj is stored bf16 in HBM (exact for 0/1 entries, halves the N^2 DMA
    # stream); h is kept f32 so the aggregation math matches the f32 reference,
    # hence the explicit upcast of the small adj tile here.
    agg_ref[...] += jnp.dot(adj_ref[...].astype(jnp.float32), h_k_ref[...],
                            preferred_element_type=jnp.float32)

    @pl.when(k == pl.num_programs(1) - 1)
    def _finalize():
        # Self term, neighbor linear, bias, ReLU -- done exactly once per row
        # tile (W_self / W_neigh stay out of the steady-state inner loop).
        out = (
            jnp.dot(h_row_ref[...], w_self_t_ref[...],
                    preferred_element_type=jnp.float32)
            + jnp.dot(agg_ref[...], w_neigh_t_ref[...],
                      preferred_element_type=jnp.float32)
            + b_ref[...]
        )
        o_ref[...] = jnp.maximum(out, 0.0).astype(o_ref.dtype)


def graphsage_conv(h, adj, weight, bias, *, block_rows=512, block_k=1024):
    """h: (N, F), adj: (N, N), weight: (O, 2F), bias: (O,). Returns (N, O) f32."""
    N, F = h.shape
    O, two_f = weight.shape
    assert two_f == 2 * F
    assert block_rows % 128 == 0 and block_k % 128 == 0

    # Lane-dense padding for features / outputs.
    F_p = _round_up(F, 128)
    O_p = _round_up(O, 128)

    # --- tile-size selection (all multiples of 128, no lcm padding cliff) ---
    N_128 = _round_up(N, 128)
    tm = min(block_rows, N_128)
    tk = min(block_k, N_128)
    # Keep >= 2 row tiles when the graph is big enough (v7x has 2 TensorCores
    # that shard the "parallel" row axis).
    if N_128 >= 256:
        tm = min(tm, max(128, (N_128 // 2) // 128 * 128))
    # Force the smaller tile to divide the larger one so padding to the larger
    # tile covers both (avoids the old lcm-based over-padding).
    if tm <= tk:
        tk -= tk % tm
    else:
        tm -= tm % tk
    N_p = _round_up(N, max(tm, tk))

    # --- input prep (zero padding contributes nothing; sliced off at end) ---
    h_p = jnp.pad(h.astype(jnp.float32), ((0, N_p - N), (0, F_p - F)))
    # TODO(synk): in a real GNN the same adjacency is reused across layers ---
    # pre-cast it to bf16 once per graph instead of per call.
    adj_bf16 = adj if adj.dtype == jnp.bfloat16 else adj.astype(jnp.bfloat16)
    adj_p = jnp.pad(adj_bf16, ((0, N_p - N), (0, N_p - N)))
    w = weight.astype(jnp.float32)
    w_self_t = jnp.pad(w[:, :F].T, ((0, F_p - F), (0, O_p - O)))   # (F_p, O_p)
    w_neigh_t = jnp.pad(w[:, F:].T, ((0, F_p - F), (0, O_p - O)))  # (F_p, O_p)
    b_p = jnp.pad(bias.astype(jnp.float32), (0, O_p - O)).reshape(1, O_p)

    grid = (N_p // tm, N_p // tk)

    # --- VMEM budget: streamed tiles (double-buffered) + resident operands ---
    vmem_bytes = (
        2 * tm * tk * 2          # adj tile (bf16), double-buffered
        + tm * tk * 4            # f32 upcast temporary of the adj tile
        + 2 * tk * F_p * 4       # h reduction chunk
        + 2 * tm * F_p * 4       # h row tile (self term)
        + 2 * 2 * F_p * O_p * 4  # W_self^T / W_neigh^T (resident)
        + 2 * O_p * 4            # bias
        + 2 * tm * O_p * 4       # output tile
        + tm * F_p * 4           # aggregation accumulator scratch
    )
    try:
        vmem_cap = int(pltpu.get_tpu_info().vmem_capacity_bytes)
    except Exception:
        vmem_cap = 64 << 20  # conservative (v7x-sized) fallback
    # ~75% of physical VMEM: 48 MiB on v7x, 96 MiB on v5e/v6e.
    vmem_limit = int(min(max(2 * vmem_bytes, 32 << 20), (vmem_cap * 3) // 4))

    out_p = pl.pallas_call(
        _graphsage_kernel,
        out_shape=jax.ShapeDtypeStruct((N_p, O_p), jnp.float32),
        grid_spec=pltpu.PrefetchScalarGridSpec(
            num_scalar_prefetch=0,
            grid=grid,
            in_specs=[
                pl.BlockSpec((tm, F_p), lambda i, k: (i, 0)),    # h rows (self term)
                pl.BlockSpec((tm, tk), lambda i, k: (i, k)),     # adj tile (bf16)
                pl.BlockSpec((tk, F_p), lambda i, k: (k, 0)),    # h reduction chunk
                pl.BlockSpec((F_p, O_p), lambda i, k: (0, 0)),   # W_self^T (resident)
                pl.BlockSpec((F_p, O_p), lambda i, k: (0, 0)),   # W_neigh^T (resident)
                pl.BlockSpec((1, O_p), lambda i, k: (0, 0)),     # bias (resident)
            ],
            out_specs=pl.BlockSpec((tm, O_p), lambda i, k: (i, 0)),
            scratch_shapes=[pltpu.VMEM((tm, F_p), jnp.float32)],  # neigh-agg acc
        ),
        compiler_params=pltpu.CompilerParams(
            dimension_semantics=("parallel", "arbitrary"),
            vmem_limit_bytes=vmem_limit,
        ),
    )(h_p, adj_p, h_p, w_self_t, w_neigh_t, b_p)

    return out_p[:N, :O]


def _reference(h, adj, weight, bias):
    # Full-precision f32 reference (matches the f32 PyTorch module semantics).
    hp = jax.lax.Precision.HIGHEST
    neigh = jnp.dot(adj, h, precision=hp)
    combined = jnp.concatenate([h, neigh], axis=1)
    out = jnp.dot(combined, weight.T, precision=hp) + bias
    return jnp.maximum(out, 0.0)


if __name__ == "__main__":
    key = jax.random.PRNGKey(0)

    def make_case(k, n_nodes, in_feats, out_feats):
        k_h, k_adj, k_w, k_b = jax.random.split(k, 4)
        h = jax.random.normal(k_h, (n_nodes, in_feats), dtype=jnp.float32)
        adj = (jax.random.uniform(k_adj, (n_nodes, n_nodes)) < 0.3).astype(jnp.float32)
        bound = 1.0 / jnp.sqrt(2.0 * in_feats)
        weight = jax.random.uniform(k_w, (out_feats, 2 * in_feats),
                                    minval=-bound, maxval=bound, dtype=jnp.float32)
        bias = jax.random.uniform(k_b, (out_feats,),
                                  minval=-bound, maxval=bound, dtype=jnp.float32)
        return h, adj, weight, bias

    cases = [
        # (N, in_feats, out_feats, block_rows, block_k)
        (16, 32, 32, 512, 1024),   # tiny / module-like shapes (single block, padded)
        (200, 48, 40, 512, 1024),  # unaligned shapes exercise padding + slicing
        (300, 64, 96, 128, 128),   # multi-step (row x reduction) grid + accumulator
    ]
    keys = jax.random.split(key, len(cases))
    for sub, (n_nodes, fi, fo, br, bk) in zip(keys, cases):
        h, adj, weight, bias = make_case(sub, n_nodes, fi, fo)
        out = graphsage_conv(h, adj, weight, bias, block_rows=br, block_k=bk)
        jax.block_until_ready(out)
        ref = _reference(h, adj, weight, bias)
        assert out.shape == ref.shape
        assert jnp.allclose(out, ref, atol=1e-3, rtol=1e-3), (
            float(jnp.max(jnp.abs(out - ref))))

    print("KERNEL_OK")
</pallas_src>

<mosaic_0001>
module attributes {stable_mosaic.version = 11 : i64} {
  func.func @_graphsage_kernel(%arg0: i32, %arg1: i32, %arg2: memref<128x128xf32, #tpu.memory_space<vmem>>, %arg3: memref<128x128xbf16, #tpu.memory_space<vmem>>, %arg4: memref<128x128xf32, #tpu.memory_space<vmem>>, %arg5: memref<128x128xf32, #tpu.memory_space<vmem>>, %arg6: memref<128x128xf32, #tpu.memory_space<vmem>>, %arg7: memref<1x128xf32, #tpu.memory_space<vmem>>, %arg8: memref<128x128xf32, #tpu.memory_space<vmem>>, %arg9: memref<128x128xf32, #tpu.memory_space<vmem>>) attributes {dimension_semantics = [#tpu.dimension_semantics<parallel>, #tpu.dimension_semantics<arbitrary>], iteration_bounds = array<i64: 1, 1>, scalar_prefetch = 0 : i64, scratch_operands = 1 : i64, tpu.core_type = #tpu.core_type<tc>, window_params = [{transform_indices = @transform_0, window_bounds = array<i64: 128, 128>}, {transform_indices = @transform_1, window_bounds = array<i64: 128, 128>}, {transform_indices = @transform_2, window_bounds = array<i64: 128, 128>}, {pipeline_mode = #tpu.pipeline_mode<synchronous>, transform_indices = @transform_3, window_bounds = array<i64: 128, 128>}, {pipeline_mode = #tpu.pipeline_mode<synchronous>, transform_indices = @transform_4, window_bounds = array<i64: 128, 128>}, {pipeline_mode = #tpu.pipeline_mode<synchronous>, transform_indices = @transform_5, window_bounds = array<i64: 1, 128>}, {transform_indices = @transform_6, window_bounds = array<i64: 128, 128>}]} {
    %c0_i32 = arith.constant 0 : i32
    %0 = arith.cmpi eq, %arg1, %c0_i32 : i32
    %1 = arith.extui %0 : i1 to i32
    %c0_i32_0 = arith.constant 0 : i32
    %2 = arith.cmpi ne, %1, %c0_i32_0 : i32
    scf.if %2 {
      %cst_10 = arith.constant 0.000000e+00 : f32
      %13 = vector.broadcast %cst_10 : f32 to vector<128x128xf32>
      %c0_11 = arith.constant 0 : index
      %c0_12 = arith.constant 0 : index
      %14 = vector.load %arg9[%c0_11, %c0_12] : memref<128x128xf32, #tpu.memory_space<vmem>>, vector<128x128xf32>
      tpu.vector_store %arg9[%c0_11, %c0_12], %13 {strides = array<i32>} : memref<128x128xf32, #tpu.memory_space<vmem>>, vector<128x128xf32>,
    } else {
    }
    %c0 = arith.constant 0 : index
    %c0_1 = arith.constant 0 : index
    %3 = vector.load %arg9[%c0, %c0_1] : memref<128x128xf32, #tpu.memory_space<vmem>>, vector<128x128xf32>
    %c0_2 = arith.constant 0 : index
    %c0_3 = arith.constant 0 : index
    %4 = vector.load %arg3[%c0_2, %c0_3] : memref<128x128xbf16, #tpu.memory_space<vmem>>, vector<128x128xbf16>
    %5 = arith.extf %4 : vector<128x128xbf16> to vector<128x128xf32>
    %c0_4 = arith.constant 0 : index
    %c0_5 = arith.constant 0 : index
    %6 = vector.load %arg4[%c0_4, %c0_5] : memref<128x128xf32, #tpu.memory_space<vmem>>, vector<128x128xf32>
    %cst = arith.constant dense<0.000000e+00> : vector<128x128xf32>
    %7 = tpu.matmul %5, %6, %cst {dimension_numbers = #tpu.dot_dimension_numbers<[1], [0], [0], [1], [0, 0, 1, 1], [], []>} : vector<128x128xf32>, vector<128x128xf32>, vector<128x128xf32> -> vector<128x128xf32>
    %8 = arith.addf %3, %7 : vector<128x128xf32>
    %c0_6 = arith.constant 0 : index
    %c0_7 = arith.constant 0 : index
    %9 = vector.load %arg9[%c0_6, %c0_7] : memref<128x128xf32, #tpu.memory_space<vmem>>, vector<128x128xf32>
    tpu.vector_store %arg9[%c0_6, %c0_7], %8 {strides = array<i32>} : memref<128x128xf32, #tpu.memory_space<vmem>>, vector<128x128xf32>,
    %c0_i32_8 = arith.constant 0 : i32
    %10 = arith.cmpi eq, %arg1, %c0_i32_8 : i32
    %11 = arith.extui %10 : i1 to i32
    %c0_i32_9 = arith.constant 0 : i32
    %12 = arith.cmpi ne, %11, %c0_i32_9 : i32
    scf.if %12 {
      %c0_10 = arith.constant 0 : index
      %c0_11 = arith.constant 0 : index
      %13 = vector.load %arg2[%c0_10, %c0_11] : memref<128x128xf32, #tpu.memory_space<vmem>>, vector<128x128xf32>
      %c0_12 = arith.constant 0 : index
      %c0_13 = arith.constant 0 : index
      %14 = vector.load %arg5[%c0_12, %c0_13] : memref<128x128xf32, #tpu.memory_space<vmem>>, vector<128x128xf32>
      %cst_14 = arith.constant dense<0.000000e+00> : vector<128x128xf32>
      %15 = tpu.matmul %13, %14, %cst_14 {dimension_numbers = #tpu.dot_dimension_numbers<[1], [0], [0], [1], [0, 0, 1, 1], [], []>} : vector<128x128xf32>, vector<128x128xf32>, vector<128x128xf32> -> vector<128x128xf32>
      %c0_15 = arith.constant 0 : index
      %c0_16 = arith.constant 0 : index
      %16 = vector.load %arg9[%c0_15, %c0_16] : memref<128x128xf32, #tpu.memory_space<vmem>>, vector<128x128xf32>
      %c0_17 = arith.constant 0 : index
      %c0_18 = arith.constant 0 : index
      %17 = vector.load %arg6[%c0_17, %c0_18] : memref<128x128xf32, #tpu.memory_space<vmem>>, vector<128x128xf32>
      %cst_19 = arith.constant dense<0.000000e+00> : vector<128x128xf32>
      %18 = tpu.matmul %16, %17, %cst_19 {dimension_numbers = #tpu.dot_dimension_numbers<[1], [0], [0], [1], [0, 0, 1, 1], [], []>} : vector<128x128xf32>, vector<128x128xf32>, vector<128x128xf32> -> vector<128x128xf32>
      %19 = arith.addf %15, %18 : vector<128x128xf32>
      %c0_20 = arith.constant 0 : index
      %c0_21 = arith.constant 0 : index
      %20 = vector.load %arg7[%c0_20, %c0_21] : memref<1x128xf32, #tpu.memory_space<vmem>>, vector<1x128xf32>
      %21 = vector.broadcast %20 : vector<1x128xf32> to vector<128x128xf32>
      %22 = arith.addf %19, %21 : vector<128x128xf32>
      %cst_22 = arith.constant 0.000000e+00 : f32
      %23 = vector.broadcast %cst_22 : f32 to vector<128x128xf32>
      %24 = arith.maximumf %22, %23 : vector<128x128xf32>
      %c0_23 = arith.constant 0 : index
      %c0_24 = arith.constant 0 : index
      %25 = vector.load %arg8[%c0_23, %c0_24] : memref<128x128xf32, #tpu.memory_space<vmem>>, vector<128x128xf32>
      tpu.vector_store %arg8[%c0_23, %c0_24], %24 {strides = array<i32>} : memref<128x128xf32, #tpu.memory_space<vmem>>, vector<128x128xf32>,
    } else {
    }
    return
  }
  func.func @transform_0(%arg0: i32, %arg1: i32) -> (i32, i32) {
    %c0_i32 = arith.constant 0 : i32
    %c0_i32_0 = arith.constant 0 : i32
    return %arg0, %c0_i32 : i32, i32
  }
  func.func @transform_1(%arg0: i32, %arg1: i32) -> (i32, i32) {
    %c0_i32 = arith.constant 0 : i32
    return %arg0, %arg1 : i32, i32
  }
  func.func @transform_2(%arg0: i32, %arg1: i32) -> (i32, i32) {
    %c0_i32 = arith.constant 0 : i32
    %c0_i32_0 = arith.constant 0 : i32
    return %arg1, %c0_i32 : i32, i32
  }
  func.func @transform_3(%arg0: i32, %arg1: i32) -> (i32, i32) {
    %c0_i32 = arith.constant 0 : i32
    %c0_i32_0 = arith.constant 0 : i32
    %c0_i32_1 = arith.constant 0 : i32
    return %c0_i32, %c0_i32_0 : i32, i32
  }
  func.func @transform_4(%arg0: i32, %arg1: i32) -> (i32, i32) {
    %c0_i32 = arith.constant 0 : i32
    %c0_i32_0 = arith.constant 0 : i32
    %c0_i32_1 = arith.constant 0 : i32
    return %c0_i32, %c0_i32_0 : i32, i32
  }
  func.func @transform_5(%arg0: i32, %arg1: i32) -> (i32, i32) {
    %c0_i32 = arith.constant 0 : i32
    %c0_i32_0 = arith.constant 0 : i32
    %c0_i32_1 = arith.constant 0 : i32
    return %c0_i32, %c0_i32_0 : i32, i32
  }
  func.func @transform_6(%arg0: i32, %arg1: i32) -> (i32, i32) {
    %c0_i32 = arith.constant 0 : i32
    %c0_i32_0 = arith.constant 0 : i32
    return %arg0, %c0_i32 : i32, i32
  }
}

</mosaic_0001>

<bundles_post_ra>
// kernel: tpu_custom_call.1
= control target key start
LH: loop header
LB: loop body
LE: loop exit
PB: predicated region body
PF: predicated region fallthrough
CT: control target
= control target key end

     0   :  { %11 = vsyncpa [#allocation4], 0  ;;  %s938_s0 = inlined_call_operand.hbm [shape: f32[128,128], index: 0, kind: input, shape index: {}]   ;;  %s939_s1 = inlined_call_operand.hbm [shape: bf16[128,128], index: 1, kind: input, shape index: {}]   ;;  %s940_s2 = inlined_call_operand.hbm [shape: f32[128,128], index: 2, kind: input, shape index: {}]   ;;  %s941_s3 = inlined_call_operand.hbm [shape: f32[128,128], index: 3, kind: input, shape index: {}]   ;;  %s942_s4 = inlined_call_operand.hbm [shape: f32[128,128], index: 4, kind: input, shape index: {}]   ;;  %s943_s5 = inlined_call_operand.vmem [shape: f32[1,128], index: 5, kind: input, shape index: {}]   ;;  %s944_s6 = inlined_call_operand.hbm [shape: f32[128,128], index: 6, kind: output, shape index: {}]  }
   0x1   :  { %12 = vsyncpa [#allocation7], 0 }
   0x2   :  { %13 = vsyncpa [#allocation10], 0  ;;  %s32_s23 = sshll.u32 %s939_s1, 4  ;;  %s33_s23 = int_to_ptr.hbm [resolvable:$true] %s32_s23 }
   0x3   :  { %14 = vsyncpa [#allocation5], 0  ;;  %s803_s24 = smov [#allocation6]   ;;  %s804_s26 = smov 64  }
   0x4   :  { %s34_s25 = sshll.u32 %s803_s24, 4  ;;  %s805_s27 = smov 4   ;;  %s35_s25 = int_to_ptr.vmem [resolvable:$true] %s34_s25 }
   0x5   :  { %40 = dma.hbm_to_vmem [thread:$0]  %s33_s23, 1024, %s35_s25, [#allocation7], %s804_s26, %s804_s26, %s805_s27  }
   0x6   :  { %s58_s30 = sshll.u32 %s941_s3, 4  ;;  %s806_s7 = smov [#allocation9]   ;;  %s59_s30 = int_to_ptr.hbm [resolvable:$true] %s58_s30 }
   0x7   :  { %s60_s8 = sshll.u32 %s806_s7, 4  ;;  %s19_s11 = sshll.u32 %s938_s0, 4  ;;  %s61_s8 = int_to_ptr.vmem [resolvable:$true] %s60_s8  ;;  %s20_s11 = int_to_ptr.hbm [resolvable:$true] %s19_s11 }
   0x8   :  { %s807_s1 = smov 128   ;;  %s808_s12 = smov 8  }
   0x9   :  { %66 = dma.hbm_to_vmem [thread:$0]  %s59_s30, 2048, %s61_s8, [#allocation10], %s807_s1, %s807_s1, %s808_s12  }
   0xa   :  { %s45_s15 = sshll.u32 %s940_s2, 4  ;;  %s809_s3 = smov [#allocation3]   ;;  %s46_s15 = int_to_ptr.hbm [resolvable:$true] %s45_s15 }
   0xb   :  { %s21_s16 = sshll.u32 %s809_s3, 4  ;;  %s810_s0 = smov [#allocation8]   ;;  %s22_s16 = int_to_ptr.vmem [resolvable:$true] %s21_s16 }
   0xc   :  { %27 = dma.hbm_to_vmem [thread:$0]  %s20_s11, 2048, %s22_s16, [#allocation4], %s807_s1, %s807_s1, %s808_s12  }
   0xd   :  { %s47_s17 = sshll.u32 %s810_s0, 4  ;;  %s71_s20 = sshll.u32 %s942_s4, 4  ;;  %s48_s17 = int_to_ptr.vmem [resolvable:$true] %s47_s17  ;;  %s72_s20 = int_to_ptr.hbm [resolvable:$true] %s71_s20 }
   0xe   :  { %53 = dma.hbm_to_vmem [thread:$0]  %s46_s15, 2048, %s48_s17, [#allocation7], %s807_s1, %s807_s1, %s808_s12  }
   0xf   :  { %s811_s2 = smov [#allocation11]  }
  0x10   :  { %s73_s21 = sshll.u32 %s811_s2, 4  ;;  %s74_s21 = int_to_ptr.vmem [resolvable:$true] %s73_s21 }
  0x11   :  { %79 = dma.hbm_to_vmem [thread:$0]  %s72_s20, 2048, %s74_s21, [#allocation10], %s807_s1, %s807_s1, %s808_s12  }
  0x12   :  { %795 = dma.done.wait [#allocation4], 2048  }
  0x13   :  { %796 = vsyncadd [#allocation4], 4294965248 }
  0x14   :  { %797 = dma.done.wait [#allocation7], 3072  }
  0x15   :  { %798 = vsyncadd [#allocation7], 4294964224 }
  0x16   :  { %799 = dma.done.wait [#allocation10], 4096  }
  0x17   :  { %800 = vsyncadd [#allocation10], 4294963200  ;;  %v185_v0 = vld [vmem:[#allocation8 + $0x78] sm:$0xff]  ;;  %v184_v1 = vld [vmem:[#allocation8 + $0x70] sm:$0xff]  ;;  %s538_s26 = sshll.u32 %s944_s6, 4  ;;  %s539_s26 = int_to_ptr.hbm [resolvable:$true] %s538_s26 }
  0x18   :  { %186 = vmatpush.msra.mxu0 %v185_v0  ;;  %592 = vmatpush.msra.mxu3 %v185_v0  ;;  %v183_v2 = vld [vmem:[#allocation8 + $0x68] sm:$0xff]  ;;  %v182_v3 = vld [vmem:[#allocation8 + $0x60] sm:$0xff]  ;;  %v181_v4 = vld [vmem:[#allocation8 + $0x58] sm:$0xff] }
  0x19   :  { %v180_v5 = vld [vmem:[#allocation8 + $0x50] sm:$0xff]  ;;  %v179_v6 = vld [vmem:[#allocation8 + $0x48] sm:$0xff]  ;;  %v178_v7 = vld [vmem:[#allocation8 + $0x40] sm:$0xff] }
  0x1a   :  { %187 = vmatpush.msra.mxu0 %v184_v1  ;;  %593 = vmatpush.msra.mxu3 %v184_v1  ;;  %v177_v8 = vld [vmem:[#allocation8 + $0x38] sm:$0xff]  ;;  %v176_v9 = vld [vmem:[#allocation8 + $0x30] sm:$0xff]  ;;  %v175_v10 = vld [vmem:[#allocation8 + $0x28] sm:$0xff] }
  0x1b   :  { %v174_v11 = vld [vmem:[#allocation8 + $0x20] sm:$0xff]  ;;  %v173_v12 = vld [vmem:[#allocation8 + $0x18] sm:$0xff]  ;;  %v172_v13 = vld [vmem:[#allocation8 + $0x10] sm:$0xff] }
  0x1c   :  { %188 = vmatpush.msra.mxu0 %v183_v2  ;;  %594 = vmatpush.msra.mxu3 %v183_v2  ;;  %v554_v14 = vld [vmem:[#allocation6] sm:$0xff]   ;;  %v590_v15 = vld [vmem:[#allocation6 + $0x30] sm:$0xff]   ;;  %v171_v16 = vld [vmem:[#allocation8 + $0x8] sm:$0xff] }
  0x1d   :  { %v170_v17 = vld [vmem:[#allocation8] sm:$0xff]  ;;  %v555_v18 = vunpack.c.l.bf16 %v554_v14  ;;  %v579_v19 = vunpack.c.l.bf16 %v590_v15  ;;  %v556_v20 = vunpack.c.h.bf16 %v554_v14  ;;  %v580_v21 = vunpack.c.h.bf16 %v590_v15  ;;  %v585_v22 = vld [vmem:[#allocation6 + $0x8] sm:$0xff]   ;;  %v591_v23 = vld [vmem:[#allocation6 + $0x38] sm:$0xff]  }
  0x1e   :  { %189 = vmatpush.msra.mxu0 %v182_v3  ;;  %595 = vmatpush.msra.mxu3 %v182_v3  ;;  %v559_v24 = vunpack.c.l.bf16 %v585_v22  ;;  %v583_v25 = vunpack.c.l.bf16 %v591_v23  ;;  %v560_v26 = vunpack.c.h.bf16 %v585_v22  ;;  %v584_v27 = vunpack.c.h.bf16 %v591_v23  ;;  %v586_v28 = vld [vmem:[#allocation6 + $0x10] sm:$0xff]   ;;  %v587_v31 = vld [vmem:[#allocation6 + $0x18] sm:$0xff]   ;;  %v588_v36 = vld [vmem:[#allocation6 + $0x20] sm:$0xff]  }
  0x1f   :  { %v563_v29 = vunpack.c.l.bf16 %v586_v28  ;;  %v564_v30 = vunpack.c.h.bf16 %v586_v28  ;;  %v567_v32 = vunpack.c.l.bf16 %v587_v31  ;;  %v568_v33 = vunpack.c.h.bf16 %v587_v31  ;;  %v875_v34 = vld [vmem:[#allocation9 + $0x78] sm:$0xff]  ;;  %v877_v35 = vld [vmem:[#allocation9 + $0x70] sm:$0xff]  ;;  %v880_v39 = vld [vmem:[#allocation9 + $0x68] sm:$0xff] }
  0x20   :  { %190 = vmatpush.msra.mxu0 %v181_v4  ;;  %596 = vmatpush.msra.mxu3 %v181_v4  ;;  %v349_v37 = vld [vmem:[#allocation11 + $0x78] sm:$0xff]  ;;  %v348_v38 = vld [vmem:[#allocation11 + $0x70] sm:$0xff]  ;;  %v347_v40 = vld [vmem:[#allocation11 + $0x68] sm:$0xff]  ;;  %v571_v41 = vunpack.c.l.bf16 %v588_v36  ;;  %v572_v50 = vunpack.c.h.bf16 %v588_v36 }
  0x21   :  { %415 = vmatpush.msra.mxu2 %v875_v34  ;;  %350 = vmatpush.msra.mxu1 %v349_v37  ;;  %v883_v42 = vld [vmem:[#allocation9 + $0x60] sm:$0xff]  ;;  %v886_v44 = vld [vmem:[#allocation9 + $0x58] sm:$0xff]  ;;  %v889_v46 = vld [vmem:[#allocation9 + $0x50] sm:$0xff] }
  0x22   :  { %191 = vmatpush.msra.mxu0 %v180_v5  ;;  %597 = vmatpush.msra.mxu3 %v180_v5  ;;  %v346_v43 = vld [vmem:[#allocation11 + $0x60] sm:$0xff]  ;;  %v345_v45 = vld [vmem:[#allocation11 + $0x58] sm:$0xff]  ;;  %v344_v47 = vld [vmem:[#allocation11 + $0x50] sm:$0xff] }
  0x23   :  { %416 = vmatpush.msra.mxu2 %v877_v35  ;;  %351 = vmatpush.msra.mxu1 %v348_v38  ;;  %v892_v48 = vld [vmem:[#allocation9 + $0x48] sm:$0xff]  ;;  %v895_v51 = vld [vmem:[#allocation9 + $0x40] sm:$0xff]  ;;  %v898_v53 = vld [vmem:[#allocation9 + $0x38] sm:$0xff] }
  0x24   :  { %192 = vmatpush.msra.mxu0 %v179_v6  ;;  %598 = vmatpush.msra.mxu3 %v179_v6  ;;  %v343_v49 = vld [vmem:[#allocation11 + $0x48] sm:$0xff]  ;;  %v342_v52 = vld [vmem:[#allocation11 + $0x40] sm:$0xff]  ;;  %v341_v54 = vld [vmem:[#allocation11 + $0x38] sm:$0xff] }
  0x25   :  { %417 = vmatpush.msra.mxu2 %v880_v39  ;;  %352 = vmatpush.msra.mxu1 %v347_v40  ;;  %v308_v55 = vld [vmem:[#allocation9 + $0x30] sm:$0xff]  ;;  %v589_v56 = vld [vmem:[#allocation6 + $0x28] sm:$0xff]   ;;  %v306_v61 = vld [vmem:[#allocation9 + $0x20] sm:$0xff] }
  0x26   :  { %193 = vmatpush.msra.mxu0 %v178_v7  ;;  %599 = vmatpush.msra.mxu3 %v178_v7  ;;  %v340_v57 = vld [vmem:[#allocation11 + $0x30] sm:$0xff]  ;;  %v307_v58 = vld [vmem:[#allocation9 + $0x28] sm:$0xff]  ;;  %v575_v60 = vunpack.c.l.bf16 %v589_v56  ;;  %v338_v62 = vld [vmem:[#allocation11 + $0x20] sm:$0xff]  ;;  %v576_v5 = vunpack.c.h.bf16 %v589_v56 }
  0x27   :  { %418 = vmatpush.msra.mxu2 %v883_v42  ;;  %353 = vmatpush.msra.mxu1 %v346_v43  ;;  %v339_v59 = vld [vmem:[#allocation11 + $0x28] sm:$0xff]  ;;  %v305_v63 = vld [vmem:[#allocation9 + $0x18] sm:$0xff]  ;;  %v304_v1 = vld [vmem:[#allocation9 + $0x10] sm:$0xff] }
  0x28   :  { %194 = vmatpush.msra.mxu0 %v177_v8  ;;  %600 = vmatpush.msra.mxu3 %v177_v8  ;;  %v337_v0 = vld [vmem:[#allocation11 + $0x18] sm:$0xff]  ;;  %v336_v2 = vld [vmem:[#allocation11 + $0x10] sm:$0xff]  ;;  %v303_v3 = vld [vmem:[#allocation9 + $0x8] sm:$0xff] }
  0x29   :  { %419 = vmatpush.msra.mxu2 %v886_v44  ;;  %354 = vmatpush.msra.mxu1 %v345_v45  ;;  %v335_v4 = vld [vmem:[#allocation11 + $0x8] sm:$0xff]  ;;  %v302_v6 = vld [vmem:[#allocation9] sm:$0xff] }
  0x2a   :  { %195 = vmatpush.msra.mxu0 %v176_v9  ;;  %601 = vmatpush.msra.mxu3 %v176_v9  ;;  %v286_v7 = vld [vmem:[#allocation3] sm:$0xff]  ;;  %v287_v9 = vld [vmem:[#allocation3 + $0x8] sm:$0xff] }
  0x2b   :  { %420 = vmatpush.msra.mxu2 %v889_v46  ;;  %355 = vmatpush.msra.mxu1 %v344_v47  ;;  %v334_v8 = vld [vmem:[#allocation11] sm:$0xff]  ;;  %v291_v14 = vld [vmem:[#allocation3 + $0x28] sm:$0xff] }
  0x2c   :  { %196 = vmatpush.msra.mxu0 %v175_v10  ;;  %602 = vmatpush.msra.mxu3 %v175_v10  ;;  %v288_v10 = vld [vmem:[#allocation3 + $0x10] sm:$0xff]  ;;  %v294_v23 = vld [vmem:[#allocation3 + $0x40] sm:$0xff] }
  0x2d   :  { %421 = vmatpush.msra.mxu2 %v892_v48  ;;  %356 = vmatpush.msra.mxu1 %v343_v49 }
  0x2e   :  { %197 = vmatpush.msra.mxu0 %v174_v11  ;;  %603 = vmatpush.msra.mxu3 %v174_v11  ;;  %v289_v11 = vld [vmem:[#allocation3 + $0x18] sm:$0xff] }
  0x2f   :  { %422 = vmatpush.msra.mxu2 %v895_v51  ;;  %357 = vmatpush.msra.mxu1 %v342_v52 }
  0x30   :  { %198 = vmatpush.msra.mxu0 %v173_v12  ;;  %604 = vmatpush.msra.mxu3 %v173_v12  ;;  %v290_v12 = vld [vmem:[#allocation3 + $0x20] sm:$0xff] }
  0x31   :  { %423 = vmatpush.msra.mxu2 %v898_v53  ;;  %358 = vmatpush.msra.mxu1 %v341_v54 }
  0x32   :  { %199 = vmatpush.msra.mxu0 %v172_v13  ;;  %605 = vmatpush.msra.mxu3 %v172_v13 }
  0x33   :  { %424 = vmatpush.msra.mxu2 %v308_v55  ;;  %359 = vmatpush.msra.mxu1 %v340_v57 }
  0x34   :  { %200 = vmatpush.msra.mxu0 %v171_v16  ;;  %606 = vmatpush.msra.mxu3 %v171_v16 }
  0x35   :  { %425 = vmatpush.msra.mxu2 %v307_v58  ;;  %360 = vmatpush.msra.mxu1 %v339_v59 }
  0x36   :  { %201 = vmatpush.msra.mxu0 %v170_v17  ;;  %607 = vmatpush.msra.mxu3 %v170_v17  ;;  %v292_v17 = vld [vmem:[#allocation3 + $0x30] sm:$0xff] }
  0x37   :  { %202 = vmatmul.f32.vlgmr.msra.gmra.mxu0 %v555_v18  ;;  %238 = vmatmul.f32.vlgmr.msra.gmra.mxu3 %v579_v19 }
  0x38   :  { %608 = vmatpush.msrb.mxu3 %v349_v37  ;;  %426 = vmatpush.msra.mxu2 %v306_v61 }
  0x39   :  { %361 = vmatpush.msra.mxu1 %v338_v62 }
  0x3a   :  { %609 = vmatpush.msrb.mxu3 %v348_v38  ;;  %427 = vmatpush.msra.mxu2 %v305_v63 }
  0x3b   :  { %362 = vmatpush.msra.mxu1 %v337_v0 }
  0x3c   :  { %610 = vmatpush.msrb.mxu3 %v347_v40  ;;  %428 = vmatpush.msra.mxu2 %v304_v1 }
  0x3d   :  { %363 = vmatpush.msra.mxu1 %v336_v2 }
  0x3e   :  { %611 = vmatpush.msrb.mxu3 %v346_v43  ;;  %429 = vmatpush.msra.mxu2 %v303_v3  ;;  %v914_v43 = vld [vmem:[%s943_s5] ss:$0 sm:$0xff]  ;;  %s812_s5 = smov [#allocation12]  }
  0x3f   :  { %205 = vmatmul.f32.gmra.mxu0 %v556_v20  ;;  %241 = vmatmul.f32.gmra.mxu3 %v580_v21  ;;  %v293_v20 = vld [vmem:[#allocation3 + $0x38] sm:$0xff]  ;;  %s536_s23 = sshll.u32 %s812_s5, 4  ;;  %s537_s23 = int_to_ptr.vmem [resolvable:$true] %s536_s23 }
  0x40   :  { %612 = vmatpush.msrb.mxu3 %v345_v45  ;;  %364 = vmatpush.msra.mxu1 %v335_v4 }
  0x41   :  { %430 = vmatpush.msra.mxu2 %v302_v6 }
  0x42   :  { %613 = vmatpush.msrb.mxu3 %v344_v47  ;;  %431 = vmatmul.f32.vlgmr.msra.gmra.mxu2 %v286_v7 }
  0x43   :  { %365 = vmatpush.msra.mxu1 %v334_v8 }
  0x44   :  { %614 = vmatpush.msrb.mxu3 %v343_v49 }
  0x46   :  { %615 = vmatpush.msrb.mxu3 %v342_v52 }
  0x47   :  { %208 = vmatmul.f32.gmra.mxu0 %v559_v24  ;;  %244 = vmatmul.f32.gmra.mxu3 %v583_v25 }
  0x48   :  { %616 = vmatpush.msrb.mxu3 %v341_v54 }
  0x4a   :  { %617 = vmatpush.msrb.mxu3 %v340_v57  ;;  %434 = vmatmul.f32.gmra.mxu2 %v287_v9 }
  0x4c   :  { %618 = vmatpush.msrb.mxu3 %v339_v59 }
  0x4e   :  { %619 = vmatpush.msrb.mxu3 %v338_v62 }
  0x4f   :  { %211 = vmatmul.f32.gmra.mxu0 %v560_v26  ;;  %247 = vmatmul.f32.gmra.mxu3 %v584_v27  ;;  %v295_v26 = vld [vmem:[#allocation3 + $0x48] sm:$0xff]  ;;  %v298_v27 = vld [vmem:[#allocation3 + $0x60] sm:$0xff] }
  0x50   :  { %620 = vmatpush.msrb.mxu3 %v337_v0 }
  0x52   :  { %621 = vmatpush.msrb.mxu3 %v336_v2  ;;  %437 = vmatmul.f32.gmra.mxu2 %v288_v10 }
  0x54   :  { %622 = vmatpush.msrb.mxu3 %v335_v4 }
  0x56   :  { %623 = vmatpush.msrb.mxu3 %v334_v8 }
  0x57   :  { %214 = vmatmul.f32.gmra.mxu0 %v563_v29  ;;  %v296_v29 = vld [vmem:[#allocation3 + $0x50] sm:$0xff] }
  0x58   :  { %624 = vmatpush.msra.mxu3 %v875_v34 }
  0x5a   :  { %625 = vmatpush.msra.mxu3 %v877_v35  ;;  %440 = vmatmul.f32.gmra.mxu2 %v289_v11  ;;  %v301_v35 = vld [vmem:[#allocation3 + $0x78] sm:$0xff] }
  0x5c   :  { %626 = vmatpush.msra.mxu3 %v880_v39 }
  0x5e   :  { %627 = vmatpush.msra.mxu3 %v883_v42 }
  0x5f   :  { %217 = vmatmul.f32.gmra.mxu0 %v564_v30  ;;  %v299_v30 = vld [vmem:[#allocation3 + $0x68] sm:$0xff] }
  0x60   :  { %628 = vmatpush.msra.mxu3 %v886_v44 }
  0x62   :  { %629 = vmatpush.msra.mxu3 %v889_v46  ;;  %443 = vmatmul.f32.gmra.mxu2 %v290_v12 }
  0x64   :  { %630 = vmatpush.msra.mxu3 %v892_v48 }
  0x66   :  { %631 = vmatpush.msra.mxu3 %v895_v51 }
  0x67   :  { %220 = vmatmul.f32.gmra.mxu0 %v567_v32  ;;  %v297_v32 = vld [vmem:[#allocation3 + $0x58] sm:$0xff] }
  0x68   :  { %632 = vmatpush.msra.mxu3 %v898_v53 }
  0x6a   :  { %633 = vmatpush.msra.mxu3 %v308_v55  ;;  %446 = vmatmul.f32.gmra.mxu2 %v291_v14 }
  0x6c   :  { %634 = vmatpush.msra.mxu3 %v307_v58 }
  0x6e   :  { %635 = vmatpush.msra.mxu3 %v306_v61 }
  0x6f   :  { %223 = vmatmul.f32.gmra.mxu0 %v568_v33  ;;  %v300_v33 = vld [vmem:[#allocation3 + $0x70] sm:$0xff] }
  0x70   :  { %636 = vmatpush.msra.mxu3 %v305_v63 }
  0x72   :  { %637 = vmatpush.msra.mxu3 %v304_v1  ;;  %449 = vmatmul.f32.gmra.mxu2 %v292_v17 }
  0x74   :  { %638 = vmatpush.msra.mxu3 %v303_v3 }
  0x76   :  { %639 = vmatpush.msra.mxu3 %v302_v6 }
  0x77   :  { %226 = vmatmul.f32.gmra.mxu0 %v571_v41 }
  0x7a   :  { %452 = vmatmul.f32.gmra.mxu2 %v293_v20 }
  0x7f   :  { %229 = vmatmul.f32.gmra.mxu0 %v572_v50 }
  0x82   :  { %455 = vmatmul.f32.gmra.mxu2 %v294_v23 }
  0x87   :  { %232 = vmatmul.f32.gmra.mxu0 %v575_v60 }
  0x8a   :  { %458 = vmatmul.f32.gmra.mxu2 %v295_v26 }
  0x8f   :  { %235 = vmatmul.f32.gmra.mxu0 %v576_v5 }
  0x92   :  { %461 = vmatmul.f32.gmra.mxu2 %v296_v29 }
  0x9a   :  { %464 = vmatmul.f32.gmra.mxu2 %v297_v32 }
  0xb4   :  { %v203_v13 = vpop.f32.mrf.mxu0 }
  0xb5   :  { %366 = vmatmul.f32.vlgmr.msra.gmra.mxu1 %v203_v13 }
  0xba   :  { %v239_v15 = vpop.f32.mrf.mxu3 }
  0xbb   :  { %402 = vmatmul.f32.vlgmr.msrb.gmra.mxu3 %v239_v15 }
  0xbc   :  { %v206_v16 = vpop.f32.mrf.mxu0 }
  0xbd   :  { %369 = vmatmul.f32.gmra.mxu1 %v206_v16 }
  0xc2   :  { %v242_v18 = vpop.f32.mrf.mxu3 }
  0xc3   :  { %405 = vmatmul.f32.gmra.mxu3 %v242_v18 }
  0xc4   :  { %v209_v19 = vpop.f32.mrf.mxu0 }
  0xc5   :  { %372 = vmatmul.f32.gmra.mxu1 %v209_v19  ;;  %v432_v40 = vpop.f32.mrf.mxu2 }
  0xca   :  { %v245_v21 = vpop.f32.mrf.mxu3 }
  0xcb   :  { %408 = vmatmul.f32.gmra.mxu3 %v245_v21 }
  0xcc   :  { %v212_v22 = vpop.f32.mrf.mxu0 }
  0xcd   :  { %375 = vmatmul.f32.gmra.mxu1 %v212_v22  ;;  %v435_v41 = vpop.f32.mrf.mxu2 }
  0xd2   :  { %v248_v24 = vpop.f32.mrf.mxu3 }
  0xd3   :  { %411 = vmatmul.f32.gmra.mxu3 %v248_v24 }
  0xd4   :  { %v215_v25 = vpop.f32.mrf.mxu0 }
  0xd5   :  { %378 = vmatmul.f32.gmra.mxu1 %v215_v25  ;;  %v438_v42 = vpop.f32.mrf.mxu2 }
  0xdb   :  { %467 = vmatmul.f32.vlgmr.msra.gmra.mxu3 %v298_v27 }
  0xdc   :  { %v218_v28 = vpop.f32.mrf.mxu0 }
  0xdd   :  { %381 = vmatmul.f32.gmra.mxu1 %v218_v28  ;;  %v441_v48 = vpop.f32.mrf.mxu2 }
  0xe3   :  { %470 = vmatmul.f32.gmra.mxu3 %v299_v30 }
  0xe4   :  { %v221_v31 = vpop.f32.mrf.mxu0 }
  0xe5   :  { %384 = vmatmul.f32.gmra.mxu1 %v221_v31  ;;  %v444_v55 = vpop.f32.mrf.mxu2 }
  0xeb   :  { %473 = vmatmul.f32.gmra.mxu3 %v300_v33 }
  0xec   :  { %v224_v34 = vpop.f32.mrf.mxu0 }
  0xed   :  { %387 = vmatmul.f32.gmra.mxu1 %v224_v34  ;;  %v447_v62 = vpop.f32.mrf.mxu2 }
  0xf3   :  { %476 = vmatmul.f32.gmra.mxu3 %v301_v35 }
  0xf4   :  { %v227_v36 = vpop.f32.mrf.mxu0 }
  0xf5   :  { %390 = vmatmul.f32.gmra.mxu1 %v227_v36  ;;  %v450_v6 = vpop.f32.mrf.mxu2 }
  0xfc   :  { %v230_v37 = vpop.f32.mrf.mxu0 }
  0xfd   :  { %393 = vmatmul.f32.gmra.mxu1 %v230_v37  ;;  %v453_v14 = vpop.f32.mrf.mxu2 }
 0x104   :  { %v233_v38 = vpop.f32.mrf.mxu0 }
 0x105   :  { %396 = vmatmul.f32.gmra.mxu1 %v233_v38  ;;  %v456_v25 = vpop.f32.mrf.mxu2 }
 0x10c   :  { %v236_v39 = vpop.f32.mrf.mxu0 }
 0x10d   :  { %399 = vmatmul.f32.gmra.mxu1 %v236_v39  ;;  %v459_v36 = vpop.f32.mrf.mxu2 }
 0x132   :  { %v367_v44 = vpop.f32.mrf.mxu1 }
 0x133   :  { %v433_v45 = vadd.f32 %v432_v40, %v367_v44 }
 0x135   :  { %v484_v46 = vadd.f32 %v914_v43, %v433_v45 }
 0x137   :  { %v500_v47 = vmax.f32 %v484_v46, 0.0 }
 0x139   :  { %516 = vst [vmem:[#allocation12] sm:$0xff] %v500_v47  ;;  %v462_v47 = vpop.f32.mrf.mxu2 }
 0x13a   :  { %v370_v49 = vpop.f32.mrf.mxu1 }
 0x13b   :  { %v436_v50 = vadd.f32 %v435_v41, %v370_v49 }
 0x13d   :  { %v485_v51 = vadd.f32 %v914_v43, %v436_v50 }
 0x13e   :  { %v403_v52 = vpop.f32.mrf.mxu3 }
 0x13f   :  { %v501_v53 = vmax.f32 %v485_v51, 0.0 }
 0x141   :  { %517 = vst [vmem:[#allocation12 + $0x8] sm:$0xff] %v501_v53  ;;  %v465_v53 = vpop.f32.mrf.mxu2 }
 0x142   :  { %v373_v54 = vpop.f32.mrf.mxu1 }
 0x143   :  { %v439_v56 = vadd.f32 %v438_v42, %v373_v54 }
 0x145   :  { %v486_v57 = vadd.f32 %v914_v43, %v439_v56 }
 0x146   :  { %v406_v58 = vpop.f32.mrf.mxu3 }
 0x147   :  { %v502_v59 = vmax.f32 %v486_v57, 0.0 }
 0x149   :  { %518 = vst [vmem:[#allocation12 + $0x10] sm:$0xff] %v502_v59 }
 0x14a   :  { %v376_v60 = vpop.f32.mrf.mxu1 }
 0x14b   :  { %v442_v61 = vadd.f32 %v441_v48, %v376_v60 }
 0x14d   :  { %v487_v63 = vadd.f32 %v914_v43, %v442_v61 }
 0x14e   :  { %v409_v0 = vpop.f32.mrf.mxu3 }
 0x14f   :  { %v503_v1 = vmax.f32 %v487_v63, 0.0 }
 0x151   :  { %519 = vst [vmem:[#allocation12 + $0x18] sm:$0xff] %v503_v1 }
 0x152   :  { %v379_v2 = vpop.f32.mrf.mxu1 }
 0x153   :  { %v445_v3 = vadd.f32 %v444_v55, %v379_v2 }
 0x155   :  { %v488_v4 = vadd.f32 %v914_v43, %v445_v3 }
 0x156   :  { %v412_v5 = vpop.f32.mrf.mxu3 }
 0x157   :  { %v504_v7 = vmax.f32 %v488_v4, 0.0 }
 0x159   :  { %520 = vst [vmem:[#allocation12 + $0x20] sm:$0xff] %v504_v7 }
 0x15a   :  { %v382_v8 = vpop.f32.mrf.mxu1 }
 0x15b   :  { %v448_v9 = vadd.f32 %v447_v62, %v382_v8 }
 0x15d   :  { %v489_v10 = vadd.f32 %v914_v43, %v448_v9 }
 0x15e   :  { %v468_v11 = vpop.f32.mrf.mxu3 }
 0x15f   :  { %v505_v12 = vmax.f32 %v489_v10, 0.0  ;;  %v469_v13 = vadd.f32 %v468_v11, %v403_v52 }
 0x161   :  { %521 = vst [vmem:[#allocation12 + $0x28] sm:$0xff] %v505_v12  ;;  %v496_v15 = vadd.f32 %v914_v43, %v469_v13 }
 0x162   :  { %v385_v16 = vpop.f32.mrf.mxu1 }
 0x163   :  { %v512_v17 = vmax.f32 %v496_v15, 0.0  ;;  %v451_v18 = vadd.f32 %v450_v6, %v385_v16 }
 0x165   :  { %528 = vst [vmem:[#allocation12 + $0x60] sm:$0xff] %v512_v17  ;;  %v490_v19 = vadd.f32 %v914_v43, %v451_v18 }
 0x166   :  { %v471_v20 = vpop.f32.mrf.mxu3 }
 0x167   :  { %v506_v21 = vmax.f32 %v490_v19, 0.0  ;;  %v472_v22 = vadd.f32 %v471_v20, %v406_v58 }
 0x169   :  { %522 = vst [vmem:[#allocation12 + $0x30] sm:$0xff] %v506_v21  ;;  %v497_v23 = vadd.f32 %v914_v43, %v472_v22 }
 0x16a   :  { %v388_v24 = vpop.f32.mrf.mxu1 }
 0x16b   :  { %v513_v26 = vmax.f32 %v497_v23, 0.0  ;;  %v454_v27 = vadd.f32 %v453_v14, %v388_v24 }
 0x16d   :  { %529 = vst [vmem:[#allocation12 + $0x68] sm:$0xff] %v513_v26  ;;  %v491_v28 = vadd.f32 %v914_v43, %v454_v27 }
 0x16e   :  { %v474_v29 = vpop.f32.mrf.mxu3 }
 0x16f   :  { %v507_v30 = vmax.f32 %v491_v28, 0.0  ;;  %v475_v31 = vadd.f32 %v474_v29, %v409_v0 }
 0x171   :  { %523 = vst [vmem:[#allocation12 + $0x38] sm:$0xff] %v507_v30  ;;  %v498_v32 = vadd.f32 %v914_v43, %v475_v31 }
 0x172   :  { %v391_v33 = vpop.f32.mrf.mxu1 }
 0x173   :  { %v514_v34 = vmax.f32 %v498_v32, 0.0  ;;  %v457_v35 = vadd.f32 %v456_v25, %v391_v33 }
 0x175   :  { %530 = vst [vmem:[#allocation12 + $0x70] sm:$0xff] %v514_v34  ;;  %v492_v37 = vadd.f32 %v914_v43, %v457_v35 }
 0x176   :  { %v477_v38 = vpop.f32.mrf.mxu3 }
 0x177   :  { %v508_v39 = vmax.f32 %v492_v37, 0.0  ;;  %v478_v40 = vadd.f32 %v477_v38, %v412_v5 }
 0x179   :  { %524 = vst [vmem:[#allocation12 + $0x40] sm:$0xff] %v508_v39  ;;  %v499_v41 = vadd.f32 %v914_v43, %v478_v40 }
 0x17a   :  { %v394_v42 = vpop.f32.mrf.mxu1 }
 0x17b   :  { %v515_v44 = vmax.f32 %v499_v41, 0.0  ;;  %v460_v45 = vadd.f32 %v459_v36, %v394_v42 }
 0x17d   :  { %531 = vst [vmem:[#allocation12 + $0x78] sm:$0xff] %v515_v44  ;;  %v493_v46 = vadd.f32 %v914_v43, %v460_v45 }
 0x17f   :  { %v509_v48 = vmax.f32 %v493_v46, 0.0 }
 0x181   :  { %525 = vst [vmem:[#allocation12 + $0x48] sm:$0xff] %v509_v48 }
 0x182   :  { %v397_v49 = vpop.f32.mrf.mxu1 }
 0x183   :  { %v463_v50 = vadd.f32 %v462_v47, %v397_v49 }
 0x185   :  { %v494_v51 = vadd.f32 %v914_v43, %v463_v50 }
 0x187   :  { %v510_v52 = vmax.f32 %v494_v51, 0.0 }
 0x189   :  { %526 = vst [vmem:[#allocation12 + $0x50] sm:$0xff] %v510_v52 }
 0x18a   :  { %v400_v54 = vpop.f32.mrf.mxu1 }
 0x18b   :  { %v466_v55 = vadd.f32 %v465_v53, %v400_v54 }
 0x18d   :  { %v495_v56 = vadd.f32 %v914_v43, %v466_v55 }
 0x18f   :  { %v511_v57 = vmax.f32 %v495_v56, 0.0 }
 0x191   :  { %527 = vst [vmem:[#allocation12 + $0x58] sm:$0xff] %v511_v57 }
 0x192   :  { %544 = dma.vmem_to_hbm [thread:$0]  %s537_s23, 2048, %s539_s26, [#allocation5], %s807_s1, %s807_s1, %s808_s12  }
 0x193   :  { %801 = dma.done.wait [#allocation5], 2048  }
 0x194   :  { %802 = vsyncadd [#allocation5], 4294965248 }
 0x195   :  { %549 = vsyncpa [#allocation4], 1 }
 0x196   :  { %550 = vsyncpa [#allocation7], 1 }
 0x197   :  { %551 = vsyncpa [#allocation10], 1 }
 0x198   :  { %552 = vsyncpa [#allocation5], 1 }

</bundles_post_ra>
